<compile_context>
chip_gen: v7x
topology: tpu7x:2x2x1
jax: 0.10.0
libtpu: 0.0.40
codegen_flags: <defaults>
</compile_context>

<pallas_src>
import functools
import math

import jax
import jax.numpy as jnp
from jax import lax
from jax.experimental import pallas as pl
from jax.experimental.pallas import tpu as pltpu

_LANE = 128
_SUBLANE = 8
_TILE = _LANE * _SUBLANE  # 1024 elements == one (8, 128) f32 vreg


def _vmem_capacity_bytes() -> int:
    """Physical VMEM per TensorCore; conservative fallback if the query fails."""
    try:
        cap = getattr(pltpu.get_tpu_info(), "vmem_capacity_bytes", None)
        if cap:
            return int(cap)
    except Exception:
        pass
    return 64 * 1024 * 1024  # v7x per-TC VMEM (smallest of the current gens)


def _l2_loss_kernel(x_ref, y_ref, o_ref, acc_ref, *,
                    tiles_total, tiles_per_chunk, inv_d, needs_mask, unroll):
    """Accumulate per-sample sum((y-x)^2); finalize to a scalar on the last chunk."""
    k = pl.program_id(1)

    @pl.when(k == 0)
    def _():
        acc_ref[...] = jnp.zeros_like(acc_ref)

    base = k * tiles_per_chunk

    def body(t, acc):
        # One (8, 128) tile at a time: two vreg loads + a few VPU ops; no large
        # VMEM temporaries regardless of the chunk size.  Upcast before the
        # vector math so bf16 inputs never touch bf16 VPU paths (v5e has none).
        x = x_ref[0, t].astype(jnp.float32)
        y = y_ref[0, t].astype(jnp.float32)
        d = y - x
        dd = d * d
        if needs_mask:
            # The last chunk may run past the array end; OOB tiles hold
            # unspecified data, so zero their contribution (where, not mul,
            # so a stray NaN cannot leak through).
            dd = jnp.where(base + t < tiles_total, dd, jnp.zeros_like(dd))
        return acc + dd

    acc = lax.fori_loop(0, tiles_per_chunk, body, acc_ref[...], unroll=unroll)
    acc_ref[...] = acc

    @pl.when(k == pl.num_programs(1) - 1)
    def _():
        # In-kernel finalize: cross-lane then cross-sublane reduce + 1/D scale;
        # the kernel's output is already the per-sample mean.
        total = jnp.sum(acc, axis=1, keepdims=True)    # (8, 1)   XLU
        total = jnp.sum(total, axis=0, keepdims=True)  # (1, 1)
        o_ref[...] = (total * inv_d).reshape(1, 1, 1)


def l2_loss_per_sample(x_hat, x_gt):
    """mean((x_gt - x_hat)**2) over all non-batch axes. Returns shape (B,)."""
    assert x_hat.shape == x_gt.shape and x_hat.ndim >= 2
    B = x_hat.shape[0]
    D = math.prod(x_hat.shape[1:])
    itemsize = jnp.dtype(x_hat.dtype).itemsize

    x2 = x_hat.reshape(B, D)
    y2 = x_gt.reshape(B, D)

    tiles_total = D // _TILE
    rem = D - tiles_total * _TILE

    if tiles_total == 0:
        # Degenerate tiny input (< 1024 features): pad up to one tile (a few
        # KB, negligible).  Padded positions have diff == 0 so the sum is exact.
        pad = ((0, 0), (0, _TILE - D))
        x_main = jnp.pad(x2, pad)
        y_main = jnp.pad(y2, pad)
        tiles_total, rem = 1, 0
    elif rem == 0:
        # Common case: free reshape, zero extra HBM copies.
        x_main, y_main = x2, y2
    else:
        # TODO(synk): rare ragged-D case; the prefix slice still costs one copy.
        x_main = x2[:, : tiles_total * _TILE]
        y_main = y2[:, : tiles_total * _TILE]

    x4 = x_main.reshape(B, tiles_total, _SUBLANE, _LANE)
    y4 = y_main.reshape(B, tiles_total, _SUBLANE, _LANE)

    # Generation-aware chunk sizing: 2 inputs x 2 pipeline buffers must fit
    # with comfortable headroom for output/scratch/Mosaic-internal scratch.
    vmem_cap = _vmem_capacity_bytes()
    pipeline_budget = min(vmem_cap // 2, 64 * 1024 * 1024)  # 32 MiB v7x, 64 MiB v5e/v6e
    block_bytes = max(_TILE * itemsize, pipeline_budget // 6)
    tiles_per_chunk = min(tiles_total, max(1, block_bytes // (_TILE * itemsize)))
    if tiles_per_chunk >= 8:
        tiles_per_chunk = (tiles_per_chunk // 8) * 8  # keep the unroll factor even
    n_chunks = pl.cdiv(tiles_total, tiles_per_chunk)
    needs_mask = (tiles_total % tiles_per_chunk) != 0
    unroll = min(8, tiles_per_chunk)

    block_actual = tiles_per_chunk * _TILE * itemsize
    vmem_limit = int(min(max(4 * block_actual + (12 << 20), 32 << 20),
                         vmem_cap * 3 // 4))

    kernel = functools.partial(
        _l2_loss_kernel,
        tiles_total=tiles_total,
        tiles_per_chunk=tiles_per_chunk,
        inv_d=1.0 / float(D),
        needs_mask=needs_mask,
        unroll=unroll,
    )

    block_in = (1, tiles_per_chunk, _SUBLANE, _LANE)
    out = pl.pallas_call(
        kernel,
        out_shape=jax.ShapeDtypeStruct((B, 1, 1), jnp.float32),
        grid_spec=pltpu.PrefetchScalarGridSpec(
            num_scalar_prefetch=0,
            grid=(B, n_chunks),
            in_specs=[
                pl.BlockSpec(block_in, lambda b, k: (b, k, 0, 0)),
                pl.BlockSpec(block_in, lambda b, k: (b, k, 0, 0)),
            ],
            out_specs=pl.BlockSpec((1, 1, 1), lambda b, k: (b, 0, 0)),
            scratch_shapes=[pltpu.VMEM((_SUBLANE, _LANE), jnp.float32)],
        ),
        compiler_params=pltpu.CompilerParams(
            dimension_semantics=("parallel", "arbitrary"),
            vmem_limit_bytes=vmem_limit,
        ),
    )(x4, y4)

    loss = out.reshape(B)
    if rem:
        # Exact epilogue for the sub-1024 tail (< 1024 elements per sample).
        xt = x2[:, tiles_total * _TILE:].astype(jnp.float32)
        yt = y2[:, tiles_total * _TILE:].astype(jnp.float32)
        loss = loss + jnp.sum((yt - xt) ** 2, axis=1) / float(D)
    return loss


class Loss:
    """JAX/Pallas port of the PyTorch `Loss` module (distance='l2' only)."""

    def __init__(self, distance: str = "l2", if_norm_reg: bool = False):
        if distance != "l2":
            # TODO(synk): 'l2-lpips' needs a pretrained LPIPS perceptual net.
            raise NotImplementedError("Only distance='l2' is implemented.")
        self.distance = distance
        self.if_norm_reg = if_norm_reg
        print("Use distance: l2")

    def __call__(self, x_hat, x_gt):
        self.loss_lpips = 0.0
        self.loss_l2 = l2_loss_per_sample(x_hat, x_gt)
        self.vec_loss = 0.2 * self.loss_lpips + self.loss_l2
        return self.vec_loss


if __name__ == "__main__":
    key = jax.random.PRNGKey(0)
    k1, k2 = jax.random.split(key)

    # Small NCHW inputs consistent with the module's image-loss forward.
    B, C, H, W = 2, 4, 16, 16
    x_hat = jax.random.normal(k1, (B, C, H, W), dtype=jnp.float32)
    x_gt = jax.random.normal(k2, (B, C, H, W), dtype=jnp.float32)

    loss_mod = Loss(distance="l2")
    vec_loss = loss_mod(x_hat, x_gt)
    vec_loss = jax.block_until_ready(vec_loss)

    # Reference check (plain JAX) of the per-sample mean-squared-error.
    ref = jnp.mean((x_gt - x_hat) ** 2, axis=(1, 2, 3))
    assert vec_loss.shape == (B,)
    assert jnp.allclose(vec_loss, ref, rtol=1e-5, atol=1e-6)

    print("KERNEL_OK")
</pallas_src>

<mosaic_0001>
module attributes {stable_mosaic.version = 11 : i64} {
  func.func @_l2_loss_kernel(%arg0: i32, %arg1: i32, %arg2: memref<1x1x8x128xf32, #tpu.memory_space<vmem>>, %arg3: memref<1x1x8x128xf32, #tpu.memory_space<vmem>>, %arg4: memref<1x1x1xf32, #tpu.memory_space<vmem>>, %arg5: memref<8x128xf32, #tpu.memory_space<vmem>>) attributes {dimension_semantics = [#tpu.dimension_semantics<parallel>, #tpu.dimension_semantics<arbitrary>], iteration_bounds = array<i64: 2, 1>, scalar_prefetch = 0 : i64, scratch_operands = 1 : i64, tpu.core_type = #tpu.core_type<tc>, window_params = [{transform_indices = @transform_0, window_bounds = array<i64: 1, 1, 8, 128>}, {transform_indices = @transform_1, window_bounds = array<i64: 1, 1, 8, 128>}, {transform_indices = @transform_2, window_bounds = array<i64: 1, 1, 1>}]} {
    %c0_i32 = arith.constant 0 : i32
    %0 = arith.cmpi eq, %arg1, %c0_i32 : i32
    %1 = arith.extui %0 : i1 to i32
    %c0_i32_0 = arith.constant 0 : i32
    %2 = arith.cmpi ne, %1, %c0_i32_0 : i32
    scf.if %2 {
      %cst = arith.constant 0.000000e+00 : f32
      %17 = vector.broadcast %cst : f32 to vector<8x128xf32>
      %c0_13 = arith.constant 0 : index
      %c0_14 = arith.constant 0 : index
      %18 = vector.load %arg5[%c0_13, %c0_14] : memref<8x128xf32, #tpu.memory_space<vmem>>, vector<8x128xf32>
      tpu.vector_store %arg5[%c0_13, %c0_14], %17 {strides = array<i32>} : memref<8x128xf32, #tpu.memory_space<vmem>>, vector<8x128xf32>,
    } else {
    }
    %c0 = arith.constant 0 : index
    %c0_1 = arith.constant 0 : index
    %3 = vector.load %arg5[%c0, %c0_1] : memref<8x128xf32, #tpu.memory_space<vmem>>, vector<8x128xf32>
    %c0_i32_2 = arith.constant 0 : i32
    %c0_3 = arith.constant 0 : index
    %4 = arith.index_cast %c0_i32_2 : i32 to index
    %c0_4 = arith.constant 0 : index
    %c0_5 = arith.constant 0 : index
    %5 = vector.load %arg2[%c0_3, %4, %c0_4, %c0_5] : memref<1x1x8x128xf32, #tpu.memory_space<vmem>>, vector<1x1x8x128xf32>
    %6 = vector.shape_cast %5 : vector<1x1x8x128xf32> to vector<8x128xf32>
    %c0_6 = arith.constant 0 : index
    %7 = arith.index_cast %c0_i32_2 : i32 to index
    %c0_7 = arith.constant 0 : index
    %c0_8 = arith.constant 0 : index
    %8 = vector.load %arg3[%c0_6, %7, %c0_7, %c0_8] : memref<1x1x8x128xf32, #tpu.memory_space<vmem>>, vector<1x1x8x128xf32>
    %9 = vector.shape_cast %8 : vector<1x1x8x128xf32> to vector<8x128xf32>
    %10 = arith.subf %9, %6 : vector<8x128xf32>
    %11 = arith.mulf %10, %10 : vector<8x128xf32>
    %12 = arith.addf %3, %11 : vector<8x128xf32>
    %c1_i32 = arith.constant 1 : i32
    %c0_9 = arith.constant 0 : index
    %c0_10 = arith.constant 0 : index
    %13 = vector.load %arg5[%c0_9, %c0_10] : memref<8x128xf32, #tpu.memory_space<vmem>>, vector<8x128xf32>
    tpu.vector_store %arg5[%c0_9, %c0_10], %12 {strides = array<i32>} : memref<8x128xf32, #tpu.memory_space<vmem>>, vector<8x128xf32>,
    %c0_i32_11 = arith.constant 0 : i32
    %14 = arith.cmpi eq, %arg1, %c0_i32_11 : i32
    %15 = arith.extui %14 : i1 to i32
    %c0_i32_12 = arith.constant 0 : i32
    %16 = arith.cmpi ne, %15, %c0_i32_12 : i32
    scf.if %16 {
      %cst = arith.constant dense<0.000000e+00> : vector<8xf32>
      %17 = vector.multi_reduction <add>, %12, %cst [1] : vector<8x128xf32> to vector<8xf32>
      %18 = vector.shape_cast %17 : vector<8xf32> to vector<8x1xf32>
      %cst_13 = arith.constant dense<0.000000e+00> : vector<1xf32>
      %19 = vector.multi_reduction <add>, %18, %cst_13 [0] : vector<8x1xf32> to vector<1xf32>
      %20 = vector.shape_cast %19 : vector<1xf32> to vector<1x1xf32>
      %cst_14 = arith.constant 9.765625E-4 : f32
      %21 = vector.broadcast %cst_14 : f32 to vector<1x1xf32>
      %22 = arith.mulf %20, %21 : vector<1x1xf32>
      %23 = vector.shape_cast %22 : vector<1x1xf32> to vector<1x1x1xf32>
      %c0_15 = arith.constant 0 : index
      %c0_16 = arith.constant 0 : index
      %c0_17 = arith.constant 0 : index
      %24 = vector.load %arg4[%c0_15, %c0_16, %c0_17] : memref<1x1x1xf32, #tpu.memory_space<vmem>>, vector<1x1x1xf32>
      tpu.vector_store %arg4[%c0_15, %c0_16, %c0_17], %23 {strides = array<i32>} : memref<1x1x1xf32, #tpu.memory_space<vmem>>, vector<1x1x1xf32>,
    } else {
    }
    return
  }
  func.func @transform_0(%arg0: i32, %arg1: i32) -> (i32, i32, i32, i32) {
    %c0_i32 = arith.constant 0 : i32
    %c0_i32_0 = arith.constant 0 : i32
    %c0_i32_1 = arith.constant 0 : i32
    return %arg0, %arg1, %c0_i32, %c0_i32_0 : i32, i32, i32, i32
  }
  func.func @transform_1(%arg0: i32, %arg1: i32) -> (i32, i32, i32, i32) {
    %c0_i32 = arith.constant 0 : i32
    %c0_i32_0 = arith.constant 0 : i32
    %c0_i32_1 = arith.constant 0 : i32
    return %arg0, %arg1, %c0_i32, %c0_i32_0 : i32, i32, i32, i32
  }
  func.func @transform_2(%arg0: i32, %arg1: i32) -> (i32, i32, i32) {
    %c0_i32 = arith.constant 0 : i32
    %c0_i32_0 = arith.constant 0 : i32
    %c0_i32_1 = arith.constant 0 : i32
    return %arg0, %c0_i32, %c0_i32_0 : i32, i32, i32
  }
}

</mosaic_0001>

<bundles_post_ra>
// kernel: tpu_custom_call.1
= control target key start
LH: loop header
LB: loop body
LE: loop exit
PB: predicated region body
PF: predicated region fallthrough
CT: control target
= control target key end

     0   :  { %7 = vsyncpa [#allocation4], 0  ;;  %s708_s0 = inlined_call_operand.hbm [shape: f32[2,1,8,128], index: 0, kind: input, shape index: {}]   ;;  %s709_s1 = inlined_call_operand.hbm [shape: f32[2,1,8,128], index: 1, kind: input, shape index: {}]   ;;  %s710_s2 = inlined_call_operand.vmem [shape: f32[2,1,1], index: 2, kind: output, shape index: {}]  }
   0x1   :  { %9 = vsyncpa [#allocation4 + $0x1], 0 }
   0x2   :  { %10 = vsyncpa [#allocation6], 0 }
   0x3   :  { %12 = vsyncpa [#allocation6 + $0x1], 0  ;;  %s536_s9 = smov 0   ;;  %s538_s10 = smov 0  }
   0x4   :  { %s540_s11 = smov 0   ;;  %s542_s12 = smov 0  }
   0x5   :  { %s544_s13 = smov 0   ;;  %s546_s14 = smov 0  }
   0x6 LB: > { %s330_s15 = sadd.s32 4294967295, %s517_s14   ;;  %s30_s16 = sadd.s32 1, %s513_s13  ;;  %s517_s14 = sphi %s546_s14, %s18_s14   ;;  %s513_s13 = sphi %s544_s13, %s724_s13   ;;  %s509_s12 = sphi %s542_s12, %s723_s12   ;;  %s505_s11 = sphi %s540_s11, %s722_s11   ;;  %s501_s10 = sphi %s538_s10, %s721_s10   ;;  %s497_s9 = sphi %s536_s9, %s720_s9  }
   0x7   : > { %p32_p0 = scmp.ge.s32.totalorder %s30_s16, 2  ;;  %s39_s17 = sadd.s32 1, %s505_s11 }
   0x8   : > { %p46_p1 = scmp.ne.s32.totalorder %s505_s11, %s501_s10  ;;  %p47_p2 = scmp.eq.s32.totalorder %s517_s14, 0 }
   0x9   : > { %s726_s16 = smov (%p32_p0, %s30_s16), 0  ;;  %p52_p4 = scmp.ne.s32.totalorder %s501_s10, %s497_s9 }
   0xa   : > { %p572_p3 = por %p47_p2, %p46_p1  ;;  %s34_s19 = ssub.s32 %s513_s13, %s726_s16 }
   0xb   : > { %p53_p5 = scmp.eq.s32.totalorder %s330_s15, 0  ;;  %p37_p6 = scmp.eq.s32.totalorder %s34_s19, 0 }
   0xc   : > { %p354_p8 = scmp.lt.s32.totalorder %s517_s14, 2  ;;  %s588_s22 = sand.u32 1, %s505_s11  }
   0xd   : > { %p579_p7 = por %p53_p5, %p52_p4  ;;  %s335_s23 = sshll.u32 %s513_s13, 7 }
   0xe   : > { %s585_s21 = scalar_select %p37_p6, %s505_s11, %s39_s17  }
   0xf   : > { %s713_s20 = scalar_select %p579_p7, 1, 0 }
  0x10   : > { %s334_s24 = sshll.u32 %s588_s22, 3  ;;  %s597_s27 = scalar_lea.hbm %s708_s0, %s335_s23 }
  0x11   : > { %s134_s28 = scalar_lea.vmem [#allocation3], %s334_s24  ;;  %p603_p9 = pnand %p354_p8, %p572_p3 }
  0x12   : > { %s142_s29 = sshll.u32 %s134_s28, 4  ;;  %s131_s3 = scalar_lea.sflag [#allocation4], %s588_s22  ;;  %s607_s29 = int_to_ptr.vmem [resolvable:$true] %s142_s29 }
  0x13   : > { %s403_s4 = scalar_lea.hbm %s597_s27, 128  ;;  %p405_p13 = pneg %p603_p9 }
  0x14   : > { %p404_p12 = scmp.ne.s32.totalorder %s597_s27, %s403_s4  ;;  %s408_s7 = scalar_lea.hbm %s708_s0, 256 }
  0x15   : > { %p409_p2 = scmp.lt.u32.totalorder %s597_s27, %s708_s0  ;;  %p410_p3 = scmp.lt.u32.totalorder %s408_s7, %s403_s4 }
  0x16   : > { %p406_p0 = pnand %p405_p13, %p404_p12  ;;  %p412_p5 = scmp.lt.u32.totalorder %s403_s4, %s597_s27 }
  0x17   : > { %p411_p4 = por %p410_p3, %p409_p2 }
  0x18   : > { %p407_p1 = pneg %p406_p0 }
  0x19   : > { %p413_p6 = por %p412_p5, %p411_p4 }
  0x1b   : > { %p414_p8 = pnand %p413_p6, %p407_p1 }
  0x1d   : > { %417 = shalt.err (!%p414_p8)
}
  0x1e   : > { %s418_s15 = scalar_lea.vmem %s607_s29, 128  ;;  %s519_s17 = smov [#allocation3]  }
  0x1f   : > { %p419_p12 = scmp.ne.s32.totalorder %s607_s29, %s418_s15  ;;  %s423_s18 = sshll.u32 %s519_s17, 4  ;;  %s424_s18 = int_to_ptr.vmem [resolvable:$false] %s423_s18 }
  0x20   : > { %s425_s19 = scalar_lea.vmem %s424_s18, 256  ;;  %p426_p11 = scmp.lt.s32.totalorder %s607_s29, %s424_s18 }
  0x21   : > { %p421_p0 = pnand %p419_p12, %p405_p13  ;;  %p427_p2 = scmp.lt.s32.totalorder %s425_s19, %s418_s15 }
  0x23   : > { %p422_p10 = pneg %p421_p0  ;;  %p428_p3 = por %p427_p2, %p426_p11 }
  0x25   : > { %p429_p4 = pnand %p428_p3, %p422_p10 }
  0x27   : > { %432 = shalt.err (!%p429_p4)
}
  0x28   : > { %350 = dma.hbm_to_vmem [thread:$0]  (!%p603_p9), %s597_s27, 128, %s607_s29, %s131_s3  }
  0x29   : > { %p715_p1 = scmp.lt.s32.totalorder %s517_s14, 3  ;;  %p716_p5 = scmp.ge.s32.totalorder %s517_s14, 1 }
  0x2a   : > { %s650_s4 = scalar_lea.hbm %s709_s1, %s335_s23  ;;  %s153_s5 = scalar_lea.vmem [#allocation5], %s334_s24 }
  0x2b   : > { %p641_p6 = pnand %p716_p5, %p715_p1  ;;  %s161_s6 = sshll.u32 %s153_s5, 4  ;;  %s162_s6 = int_to_ptr.vmem [resolvable:$true] %s161_s6 }
  0x2c   : > { %s150_s27 = scalar_lea.sflag [#allocation6], %s588_s22  ;;  %s433_s29 = scalar_lea.hbm %s650_s4, 128 }
  0x2d   : > { %s717_s25 = scalar_select %p641_p6, 1, 0 }
  0x2e   : > { %p434_p10 = scmp.ne.s32.totalorder %s650_s4, %s433_s29  ;;  %s438_s23 = scalar_lea.hbm %s709_s1, 256 }
  0x2f   : > { %p439_p12 = scmp.lt.u32.totalorder %s650_s4, %s709_s1  ;;  %p440_p0 = scmp.lt.u32.totalorder %s438_s23, %s433_s29 }
  0x30   : > { %p436_p11 = pnand %p434_p10, %p405_p13  ;;  %p442_p3 = scmp.lt.u32.totalorder %s433_s29, %s650_s4 }
  0x31   : > { %p441_p2 = por %p440_p0, %p439_p12 }
  0x32   : > { %p437_p8 = pneg %p436_p11 }
  0x33   : > { %p443_p4 = por %p442_p3, %p441_p2 }
  0x35   : > { %p444_p1 = pnand %p443_p4, %p437_p8 }
  0x37   : > { %447 = shalt.err (!%p444_p1)
}
  0x38   : > { %s448_s22 = scalar_lea.vmem %s162_s6, 128  ;;  %s520_s24 = smov [#allocation5]  }
  0x39   : > { %p449_p5 = scmp.ne.s32.totalorder %s162_s6, %s448_s22  ;;  %s453_s15 = sshll.u32 %s520_s24, 4  ;;  %s454_s15 = int_to_ptr.vmem [resolvable:$false] %s453_s15 }
  0x3a   : > { %s455_s17 = scalar_lea.vmem %s454_s15, 256  ;;  %p456_p7 = scmp.lt.s32.totalorder %s162_s6, %s454_s15 }
  0x3b   : > { %p451_p10 = pnand %p449_p5, %p405_p13  ;;  %p457_p6 = scmp.lt.s32.totalorder %s455_s17, %s448_s22 }
  0x3d   : > { %p452_p11 = pneg %p451_p10  ;;  %p458_p0 = por %p457_p6, %p456_p7 }
  0x3f   : > { %p459_p12 = pnand %p458_p0, %p452_p11 }
  0x41   : > { %462 = shalt.err (!%p459_p12)
}
  0x42   : > { %353 = dma.hbm_to_vmem [thread:$0]  (!%p603_p9), %s650_s4, 128, %s162_s6, %s150_s27  }
  0x43   : > { %p718_p8 = scmp.ne.s32.totalorder %s717_s25, 0 }
  0x44   : > { %s172_s18 = sand.u32 (!%p718_p8), 1, %s501_s10   ;;  %p719_p13 = scmp.ne.s32.totalorder (!%p718_p8), %s713_s20, 0 }
  0x45   : > { %170 = sbr.rel (%p718_p8) target bundleno = 241 (0xf1), region = 28  ;;  %s339_s19 = sshll.u32 (!%p718_p8), %s172_s18, 3 }
  0x46   : > { %s173_s26 = scalar_lea.sflag (!%p718_p8), [#allocation4], %s172_s18  ;;  %s176_s28 = scalar_lea.vmem (!%p718_p8), [#allocation3], %s339_s19 }
  0x4c   : > { %488 = dma.done.wait (%p719_p13), %s173_s26, 128  }
  0x4d   : > { %490 = vsyncadd (%p719_p13), %s173_s26, 4294967168  ;;  %s182_s5 = scalar_lea.sflag [#allocation6], %s172_s18  ;;  %s185_s29 = scalar_lea.vmem [#allocation5], %s339_s19 }
  0x4e   : > { %492 = dma.done.wait (%p719_p13), %s182_s5, 128  }
  0x4f   : > { %494 = vsyncadd (%p719_p13), %s182_s5, 4294967168  ;;  %v218_v0 = vld [vmem:[%s176_s28] sm:$0xff]  ;;  %v219_v1 = vld [vmem:[%s185_s29] sm:$0xff]  ;;  %p209_p7 = scmp.lt.s32.totalorder %s509_s12, 1  ;;  %vm236_vm0 = vcmask 0  }
  0x50   : > { %v220_v2 = vsub.f32 %v219_v1, %v218_v0 }
  0x51   : > { %s728_s12 = smov (!%p209_p7, %s509_s12), 1 }
  0x52   : > { %v221_v3 = vmul.f32 %v220_v2, %v220_v2  ;;  %s211_s20 = scalar_lea.vmem %s710_s2, %s728_s12 }
  0x54   : > { %227 = vadd.xlane.f32.xlu0 %v221_v3 }
  0xe1   : > { %v228_v4 = vpop.xlane.xlu0 %227 }
  0xe2   : > { %v229_v5 = vrot.slane %v228_v4, 4 }
  0xe4   : > { %v230_v6 = vadd.f32 %v229_v5, %v228_v4 }
  0xe6   : > { %v231_v7 = vrot.slane %v230_v6, 2 }
  0xe8   : > { %v232_v8 = vadd.f32 %v231_v7, %v230_v6 }
  0xea   : > { %v233_v9 = vrot.slane %v232_v8, 1 }
  0xec   : > { %v234_v10 = vadd.f32 %v233_v9, %v232_v8 }
  0xee   : > { %v235_v11 = vmul.f32 0.0009765625, %v234_v10 }
  0xf0   : > { %237 = vst.msk [vmem:[%s211_s20] sm:$0x1] %vm236_vm0, %v235_v11 }
  0xf1 PF: > { %s18_s14 = sadd.s32 1, %s517_s14   ;;  %s720_s9 = smov %s501_s10 }
  0xf2   : > { %p15_p9 = scmp.ge.s32.totalorder %s18_s14, 4   ;;  %s721_s10 = smov %s505_s11 }
  0xf3   : > { %s722_s11 = smov %s585_s21  ;;  %s723_s12 = smov %s513_s13 }
  0xf4   : > { %s724_s13 = smov %s726_s16  ;;  %17 = sbr.rel (!%p15_p9) target bundleno = 6 (0x6), region = 89 }
  0xfb   :  { %255 = vsyncpa [#allocation4], 1 }
  0xfc   :  { %257 = vsyncpa [#allocation4 + $0x1], 1 }
  0xfd   :  { %258 = vsyncpa [#allocation6], 1 }
  0xfe   :  { %260 = vsyncpa [#allocation6 + $0x1], 1 }

</bundles_post_ra>
